<compile_context>
chip_gen: v7x
topology: tpu7x:2x2x1
jax: 0.10.0
libtpu: 0.0.40
codegen_flags: <defaults>
</compile_context>

<pallas_src>
import functools

import jax
import jax.numpy as jnp
from jax import lax
from jax.experimental import pallas as pl
from jax.experimental.pallas import tpu as pltpu


def _edge_softmax_kernel(e_ref, w_ref, alpha_ref, m_ref, l_ref, *,
                         n_edges, tile_e, edge_dim):
    """Fused two-phase global edge softmax of Linear(edge_dim->1)(e).

    grid = (2, num_tiles): phase 0 -> running max / sum-exp, phase 1 -> normalize.

    e_ref     : (edge_dim, tile_e) lane-dense edge-feature tile (VMEM)
    w_ref     : (edge_dim,)        attention weight scalars (SMEM)
    alpha_ref : (1, tile_e)        normalized attention (written in phase 1 only)
    m_ref     : (1, 1) VMEM scratch, running max        (persists across grid)
    l_ref     : (1, 1) VMEM scratch, running sum-exp    (persists across grid)
    """
    phase = pl.program_id(0)          # 0: stats, 1: normalize
    i = pl.program_id(1)              # edge tile index
    num_tiles = pl.num_programs(1)

    # Linear(edge_dim -> 1, bias=False): unrolled scalar(SMEM)-broadcast MACs
    # on a lane-dense tile -> (1, tile_e) logits.  Pure VPU work; no
    # cross-sublane reduce, no K~2 / N=1 MXU matmul.
    a = e_ref[0:1, :] * w_ref[0]
    for k in range(1, edge_dim):
        a = a + e_ref[k:k + 1, :] * w_ref[k]

    @pl.when(phase == 0)
    def _stats_phase():
        @pl.when(i == 0)
        def _():
            m_ref[...] = jnp.full_like(m_ref, -jnp.inf)
            l_ref[...] = jnp.zeros_like(l_ref)

        def update(logits):
            m_prev = m_ref[...]
            m_new = jnp.maximum(m_prev, jnp.max(logits, axis=-1, keepdims=True))
            l_ref[...] = (l_ref[...] * jnp.exp(m_prev - m_new)
                          + jnp.sum(jnp.exp(logits - m_new), axis=-1,
                                    keepdims=True))
            m_ref[...] = m_new

        if n_edges % tile_e == 0:
            # Statically no padded lanes anywhere: never mask.
            update(a)
        else:
            # Only the final tile can contain out-of-range lanes.
            @pl.when(i != num_tiles - 1)
            def _():
                update(a)

            @pl.when(i == num_tiles - 1)
            def _():
                col = i * tile_e + lax.broadcasted_iota(jnp.int32, a.shape, 1)
                update(jnp.where(col < n_edges, a, -jnp.inf))

    @pl.when(phase == 1)
    def _normalize_phase():
        inv_l = 1.0 / l_ref[...]                 # exact reciprocal of scalar l
        alpha_ref[...] = jnp.exp(a - m_ref[...]) * inv_l
        # Out-of-range lanes of the final tile hold garbage, but they fall
        # outside the (1, E) output array so Pallas drops those stores.


def edge_attention_softmax(edge_features_t, w, *, tile_e=128 * 1024,
                           vmem_limit_bytes=48 * 1024 * 1024):
    """Global softmax of Linear(edge_dim->1)(e) over all edges.

    edge_features_t: (edge_dim, E) float32, lane-dense (edge index on lanes).
                     Storing edge features in this layout upstream avoids any
                     wrapper-side relayout.
    w:               (edge_dim,)   float32 e_group_attn_fc weight (no bias).
    Returns alpha:   (1, E) float32, lane-dense.
    """
    edge_dim, E = edge_features_t.shape
    assert w.shape == (edge_dim,)
    if E == 0:
        return jnp.zeros((1, 0), jnp.float32)

    LANE = 128
    e_ceil = pl.cdiv(E, LANE) * LANE
    tile = max(LANE, min(pl.cdiv(tile_e, LANE) * LANE, e_ceil))
    num_tiles = pl.cdiv(E, tile)

    kernel = functools.partial(_edge_softmax_kernel, n_edges=E, tile_e=tile,
                               edge_dim=edge_dim)
    return pl.pallas_call(
        kernel,
        out_shape=jax.ShapeDtypeStruct((1, E), jnp.float32),
        grid=(2, num_tiles),                                  # (phase, tile)
        in_specs=[
            pl.BlockSpec((edge_dim, tile), lambda p, i: (0, i)),
            pl.BlockSpec(memory_space=pltpu.MemorySpace.SMEM),  # w: scalars
        ],
        # Phase 0 never writes alpha: park its output window on block 0 so the
        # only writebacks are the real phase-1 tiles.
        out_specs=pl.BlockSpec((1, tile), lambda p, i: (0, i * p)),
        scratch_shapes=[
            pltpu.VMEM((1, 1), jnp.float32),   # running max  m
            pltpu.VMEM((1, 1), jnp.float32),   # running sum-exp l
        ],
        compiler_params=pltpu.CompilerParams(
            # Both axes carry the running (m, l) state -> sequential.
            # TODO(synk): a 2-TC split of phase 0 with per-core partial (m, l)
            #             combined in an epilogue would help on v7x when
            #             compute-bound.
            dimension_semantics=("arbitrary", "arbitrary"),
            vmem_limit_bytes=vmem_limit_bytes),
    )(edge_features_t, w)


def edgnn_forward(node_features, edge_features, w_attn, *, tile_e=128 * 1024):
    """Pallas implementation of Model.forward's numeric path.

    node_features: (N, node_dim)   g.ndata['z']
    edge_features: (E, edge_dim)   g.edata['e']  (module layout)
    w_attn:        (edge_dim, 1) or (edge_dim,)  e_group_attn_fc weight

    Returns:
      h:     (N, node_dim)  == node_features (identity; what the reference
                            stores as g.ndata['h_0'])
      alpha: (1, E) f32     lane-dense softmax edge attention computed inside
                            edge_weight (debug-only in the reference; it is
                            never written back to the graph).
    """
    # TODO(synk): the reference's group_apply_edges applies its softmax per
    #             (src, dst) edge group; since edge_weight writes nothing back,
    #             h is unaffected, so one global softmax over all E edges is
    #             exposed as the representative numeric path.
    E, edge_dim = edge_features.shape
    w = w_attn.reshape(-1).astype(jnp.float32)
    assert w.shape == (edge_dim,)

    # Identity pass-through: no kernel, no copy, no extra HBM traffic.
    h = node_features

    # Lane-dense layout (edge index on the lane axis).  This transpose is the
    # one remaining XLA relayout pass; callers that already store edge
    # features as (edge_dim, E) should call edge_attention_softmax directly.
    e_t = edge_features.astype(jnp.float32).T
    alpha = edge_attention_softmax(e_t, w, tile_e=tile_e)
    return h, alpha


if __name__ == "__main__":
    key = jax.random.PRNGKey(0)
    k_z, k_attn, k_e1, k_e2, k_e3 = jax.random.split(key, 5)

    # Small shapes consistent with the module: node_dim=1, edge_dim=2.
    N, node_dim, edge_dim = 8, 1, 2

    node_features = jax.random.normal(k_z, (N, node_dim), dtype=jnp.float32)
    # e_group_attn_fc weight (no bias).
    w_attn = (jax.random.uniform(k_attn, (edge_dim, 1), minval=-1.0,
                                 maxval=1.0, dtype=jnp.float32)
              / jnp.sqrt(edge_dim))

    def check(E, key_e, tile_e):
        edge_features = jax.random.normal(key_e, (E, edge_dim),
                                          dtype=jnp.float32)
        fwd = jax.jit(functools.partial(edgnn_forward, tile_e=tile_e))
        h, alpha = jax.block_until_ready(
            fwd(node_features, edge_features, w_attn))

        assert h.shape == (N, node_dim)
        assert jnp.array_equal(h, node_features), "identity pass-through"
        assert alpha.shape == (1, E)
        alpha_ref = jax.nn.softmax(edge_features @ w_attn, axis=0)[:, 0]
        assert jnp.allclose(alpha[0], alpha_ref, atol=1e-6, rtol=2e-3), \
            f"softmax mismatch (E={E})"
        assert jnp.allclose(jnp.sum(alpha), 1.0, atol=5e-4), \
            f"sum(alpha) != 1 (E={E})"

    check(16, k_e1, 128 * 1024)   # single tile, masked tail (E < 128)
    check(1000, k_e2, 256)        # 4 tiles, masked final tile (online softmax)
    check(512, k_e3, 128)         # 4 tiles, exactly divisible (no-mask path)

    print("KERNEL_OK")
</pallas_src>

<mosaic_0001>
module attributes {stable_mosaic.version = 11 : i64} {
  func.func @_edge_softmax_kernel(%arg0: i32, %arg1: i32, %arg2: memref<2x128xf32, #tpu.memory_space<vmem>>, %arg3: memref<2xf32, #tpu.memory_space<smem>>, %arg4: memref<1x128xf32, #tpu.memory_space<vmem>>, %arg5: memref<1x1xf32, #tpu.memory_space<vmem>>, %arg6: memref<1x1xf32, #tpu.memory_space<vmem>>) attributes {dimension_semantics = [#tpu.dimension_semantics<arbitrary>, #tpu.dimension_semantics<arbitrary>], iteration_bounds = array<i64: 2, 1>, scalar_prefetch = 0 : i64, scratch_operands = 2 : i64, tpu.core_type = #tpu.core_type<tc>, window_params = [{transform_indices = @transform_0, window_bounds = array<i64: 2, 128>}, {transform_indices = @transform_1, window_bounds = array<i64: 2>}, {transform_indices = @transform_2, window_bounds = array<i64: 1, 128>}]} {
    %c0 = arith.constant 0 : index
    %c0_0 = arith.constant 0 : index
    %0 = vector.load %arg2[%c0, %c0_0] : memref<2x128xf32, #tpu.memory_space<vmem>>, vector<1x128xf32>
    %c0_1 = arith.constant 0 : index
    %1 = memref.load %arg3[%c0_1] : memref<2xf32, #tpu.memory_space<smem>>
    %2 = vector.broadcast %1 : f32 to vector<1x128xf32>
    %3 = arith.mulf %0, %2 : vector<1x128xf32>
    %c1 = arith.constant 1 : index
    %c0_2 = arith.constant 0 : index
    %4 = vector.load %arg2[%c1, %c0_2] : memref<2x128xf32, #tpu.memory_space<vmem>>, vector<1x128xf32>
    %c1_3 = arith.constant 1 : index
    %5 = memref.load %arg3[%c1_3] : memref<2xf32, #tpu.memory_space<smem>>
    %6 = vector.broadcast %5 : f32 to vector<1x128xf32>
    %7 = arith.mulf %4, %6 : vector<1x128xf32>
    %8 = arith.addf %3, %7 : vector<1x128xf32>
    %c0_i32 = arith.constant 0 : i32
    %9 = arith.cmpi eq, %arg0, %c0_i32 : i32
    %10 = arith.extui %9 : i1 to i32
    %c0_i32_4 = arith.constant 0 : i32
    %11 = arith.cmpi ne, %10, %c0_i32_4 : i32
    scf.if %11 {
      %c0_i32_6 = arith.constant 0 : i32
      %15 = arith.cmpi eq, %arg1, %c0_i32_6 : i32
      %16 = arith.extui %15 : i1 to i32
      %c0_i32_7 = arith.constant 0 : i32
      %17 = arith.cmpi ne, %16, %c0_i32_7 : i32
      scf.if %17 {
        %cst = arith.constant 0xFF800000 : f32
        %24 = vector.broadcast %cst : f32 to vector<1x1xf32>
        %c0_12 = arith.constant 0 : index
        %c0_13 = arith.constant 0 : index
        %25 = vector.load %arg5[%c0_12, %c0_13] : memref<1x1xf32, #tpu.memory_space<vmem>>, vector<1x1xf32>
        tpu.vector_store %arg5[%c0_12, %c0_13], %24 {strides = array<i32>} : memref<1x1xf32, #tpu.memory_space<vmem>>, vector<1x1xf32>,
        %cst_14 = arith.constant 0.000000e+00 : f32
        %26 = vector.broadcast %cst_14 : f32 to vector<1x1xf32>
        %c0_15 = arith.constant 0 : index
        %c0_16 = arith.constant 0 : index
        %27 = vector.load %arg6[%c0_15, %c0_16] : memref<1x1xf32, #tpu.memory_space<vmem>>, vector<1x1xf32>
        tpu.vector_store %arg6[%c0_15, %c0_16], %26 {strides = array<i32>} : memref<1x1xf32, #tpu.memory_space<vmem>>, vector<1x1xf32>,
      } else {
      }
      %c0_i32_8 = arith.constant 0 : i32
      %18 = arith.cmpi ne, %arg1, %c0_i32_8 : i32
      %19 = arith.extui %18 : i1 to i32
      %c0_i32_9 = arith.constant 0 : i32
      %20 = arith.cmpi ne, %19, %c0_i32_9 : i32
      scf.if %20 {
        %c0_12 = arith.constant 0 : index
        %c0_13 = arith.constant 0 : index
        %24 = vector.load %arg5[%c0_12, %c0_13] : memref<1x1xf32, #tpu.memory_space<vmem>>, vector<1x1xf32>
        %cst = arith.constant dense<0xFF800000> : vector<1xf32>
        %25 = vector.multi_reduction <maximumf>, %8, %cst [1] : vector<1x128xf32> to vector<1xf32>
        %26 = vector.shape_cast %25 : vector<1xf32> to vector<1x1xf32>
        %27 = arith.maximumf %24, %26 : vector<1x1xf32>
        %c0_14 = arith.constant 0 : index
        %c0_15 = arith.constant 0 : index
        %28 = vector.load %arg6[%c0_14, %c0_15] : memref<1x1xf32, #tpu.memory_space<vmem>>, vector<1x1xf32>
        %29 = arith.subf %24, %27 : vector<1x1xf32>
        %30 = math.exp %29 : vector<1x1xf32>
        %31 = arith.mulf %28, %30 : vector<1x1xf32>
        %32 = vector.broadcast %27 : vector<1x1xf32> to vector<1x128xf32>
        %33 = arith.subf %8, %32 : vector<1x128xf32>
        %34 = math.exp %33 : vector<1x128xf32>
        %cst_16 = arith.constant dense<0.000000e+00> : vector<1xf32>
        %35 = vector.multi_reduction <add>, %34, %cst_16 [1] : vector<1x128xf32> to vector<1xf32>
        %36 = vector.shape_cast %35 : vector<1xf32> to vector<1x1xf32>
        %37 = arith.addf %31, %36 : vector<1x1xf32>
        %c0_17 = arith.constant 0 : index
        %c0_18 = arith.constant 0 : index
        %38 = vector.load %arg6[%c0_17, %c0_18] : memref<1x1xf32, #tpu.memory_space<vmem>>, vector<1x1xf32>
        tpu.vector_store %arg6[%c0_17, %c0_18], %37 {strides = array<i32>} : memref<1x1xf32, #tpu.memory_space<vmem>>, vector<1x1xf32>,
        %c0_19 = arith.constant 0 : index
        %c0_20 = arith.constant 0 : index
        %39 = vector.load %arg5[%c0_19, %c0_20] : memref<1x1xf32, #tpu.memory_space<vmem>>, vector<1x1xf32>
        tpu.vector_store %arg5[%c0_19, %c0_20], %27 {strides = array<i32>} : memref<1x1xf32, #tpu.memory_space<vmem>>, vector<1x1xf32>,
      } else {
      }
      %c0_i32_10 = arith.constant 0 : i32
      %21 = arith.cmpi eq, %arg1, %c0_i32_10 : i32
      %22 = arith.extui %21 : i1 to i32
      %c0_i32_11 = arith.constant 0 : i32
      %23 = arith.cmpi ne, %22, %c0_i32_11 : i32
      scf.if %23 {
        %c128_i32 = arith.constant 128 : i32
        %24 = arith.muli %arg1, %c128_i32 : i32
        %25 = tpu.iota {dimensions = array<i32: 1>} : vector<1x128xi32>
        %26 = vector.broadcast %24 : i32 to vector<1x128xi32>
        %27 = arith.addi %26, %25 : vector<1x128xi32>
        %c16_i32 = arith.constant 16 : i32
        %28 = vector.broadcast %c16_i32 : i32 to vector<1x128xi32>
        %29 = arith.cmpi slt, %27, %28 : vector<1x128xi32>
        %cst = arith.constant 0xFF800000 : f32
        %30 = vector.broadcast %cst : f32 to vector<1x128xf32>
        %31 = arith.select %29, %8, %30 : vector<1x128xi1>, vector<1x128xf32>
        %c0_12 = arith.constant 0 : index
        %c0_13 = arith.constant 0 : index
        %32 = vector.load %arg5[%c0_12, %c0_13] : memref<1x1xf32, #tpu.memory_space<vmem>>, vector<1x1xf32>
        %cst_14 = arith.constant dense<0xFF800000> : vector<1xf32>
        %33 = vector.multi_reduction <maximumf>, %31, %cst_14 [1] : vector<1x128xf32> to vector<1xf32>
        %34 = vector.shape_cast %33 : vector<1xf32> to vector<1x1xf32>
        %35 = arith.maximumf %32, %34 : vector<1x1xf32>
        %c0_15 = arith.constant 0 : index
        %c0_16 = arith.constant 0 : index
        %36 = vector.load %arg6[%c0_15, %c0_16] : memref<1x1xf32, #tpu.memory_space<vmem>>, vector<1x1xf32>
        %37 = arith.subf %32, %35 : vector<1x1xf32>
        %38 = math.exp %37 : vector<1x1xf32>
        %39 = arith.mulf %36, %38 : vector<1x1xf32>
        %40 = vector.broadcast %35 : vector<1x1xf32> to vector<1x128xf32>
        %41 = arith.subf %31, %40 : vector<1x128xf32>
        %42 = math.exp %41 : vector<1x128xf32>
        %cst_17 = arith.constant dense<0.000000e+00> : vector<1xf32>
        %43 = vector.multi_reduction <add>, %42, %cst_17 [1] : vector<1x128xf32> to vector<1xf32>
        %44 = vector.shape_cast %43 : vector<1xf32> to vector<1x1xf32>
        %45 = arith.addf %39, %44 : vector<1x1xf32>
        %c0_18 = arith.constant 0 : index
        %c0_19 = arith.constant 0 : index
        %46 = vector.load %arg6[%c0_18, %c0_19] : memref<1x1xf32, #tpu.memory_space<vmem>>, vector<1x1xf32>
        tpu.vector_store %arg6[%c0_18, %c0_19], %45 {strides = array<i32>} : memref<1x1xf32, #tpu.memory_space<vmem>>, vector<1x1xf32>,
        %c0_20 = arith.constant 0 : index
        %c0_21 = arith.constant 0 : index
        %47 = vector.load %arg5[%c0_20, %c0_21] : memref<1x1xf32, #tpu.memory_space<vmem>>, vector<1x1xf32>
        tpu.vector_store %arg5[%c0_20, %c0_21], %35 {strides = array<i32>} : memref<1x1xf32, #tpu.memory_space<vmem>>, vector<1x1xf32>,
      } else {
      }
    } else {
    }
    %c1_i32 = arith.constant 1 : i32
    %12 = arith.cmpi eq, %arg0, %c1_i32 : i32
    %13 = arith.extui %12 : i1 to i32
    %c0_i32_5 = arith.constant 0 : i32
    %14 = arith.cmpi ne, %13, %c0_i32_5 : i32
    scf.if %14 {
      %c0_6 = arith.constant 0 : index
      %c0_7 = arith.constant 0 : index
      %15 = vector.load %arg6[%c0_6, %c0_7] : memref<1x1xf32, #tpu.memory_space<vmem>>, vector<1x1xf32>
      %cst = arith.constant 1.000000e+00 : f32
      %16 = vector.broadcast %cst : f32 to vector<1x1xf32>
      %17 = arith.divf %16, %15 : vector<1x1xf32>
      %c0_8 = arith.constant 0 : index
      %c0_9 = arith.constant 0 : index
      %18 = vector.load %arg5[%c0_8, %c0_9] : memref<1x1xf32, #tpu.memory_space<vmem>>, vector<1x1xf32>
      %19 = vector.broadcast %18 : vector<1x1xf32> to vector<1x128xf32>
      %20 = arith.subf %8, %19 : vector<1x128xf32>
      %21 = math.exp %20 : vector<1x128xf32>
      %22 = vector.broadcast %17 : vector<1x1xf32> to vector<1x128xf32>
      %23 = arith.mulf %21, %22 : vector<1x128xf32>
      %c0_10 = arith.constant 0 : index
      %c0_11 = arith.constant 0 : index
      %24 = vector.load %arg4[%c0_10, %c0_11] : memref<1x128xf32, #tpu.memory_space<vmem>>, vector<1x128xf32>
      tpu.vector_store %arg4[%c0_10, %c0_11], %23 {strides = array<i32>} : memref<1x128xf32, #tpu.memory_space<vmem>>, vector<1x128xf32>,
    } else {
    }
    return
  }
  func.func @transform_0(%arg0: i32, %arg1: i32) -> (i32, i32) {
    %c0_i32 = arith.constant 0 : i32
    %c0_i32_0 = arith.constant 0 : i32
    return %c0_i32, %arg1 : i32, i32
  }
  func.func @transform_1(%arg0: i32, %arg1: i32) -> i32 {
    %c0_i32 = arith.constant 0 : i32
    %c0_i32_0 = arith.constant 0 : i32
    return %c0_i32 : i32
  }
  func.func @transform_2(%arg0: i32, %arg1: i32) -> (i32, i32) {
    %0 = arith.muli %arg1, %arg0 : i32
    %c0_i32 = arith.constant 0 : i32
    %c0_i32_0 = arith.constant 0 : i32
    return %c0_i32, %0 : i32, i32
  }
}

</mosaic_0001>

<bundles_post_ra>
// kernel: edgnn_forward.1
= control target key start
LH: loop header
LB: loop body
LE: loop exit
PB: predicated region body
PF: predicated region fallthrough
CT: control target
= control target key end

     0   :  { %7 = vsyncpa [#allocation6], 0  ;;  %s648_s0 = inlined_call_operand.vmem [shape: f32[2,16], index: 0, kind: input, shape index: {}]   ;;  %s649_s1 = inlined_call_operand.vmem [shape: f32[2], index: 1, kind: input, shape index: {}]   ;;  %s650_s2 = inlined_call_operand.hbm [shape: f32[1,16], index: 2, kind: output, shape index: {}]  }
   0x1   :  { %8 = vsyncpa [#allocation5], 0 }
   0x2   :  { %10 = vsyncpa [#allocation5 + $0x1], 0  ;;  %s553_s9 = smov 0   ;;  %s555_s10 = smov 0  }
   0x3   :  { %s557_s11 = smov 0  }
   0x4 LB: > { %s384_s12 = sadd.s32 4294967295, %s530_s11   ;;  %s385_s13 = sadd.s32 4294967294, %s530_s11   ;;  %s530_s11 = sphi %s557_s11, %s16_s11   ;;  %s526_s10 = sphi %s555_s10, %s655_s10   ;;  %s522_s9 = sphi %s553_s9, %s654_s9  }
   0x5   : > { %s28_s14 = sadd.s32 1, %s526_s10  ;;  %p386_p0 = scmp.ge.s32.totalorder %s530_s11, 1 }
   0x6   : > { %p30_p1 = scmp.ge.s32.totalorder %s28_s14, 2  ;;  %p108_p2 = scmp.lt.s32.totalorder %s530_s11, 3 }
   0x7   : > { %p575_p3 = scmp.eq.s32.totalorder %s384_s12, 0  ;;  %s128_s19 = sshll.u32 %s649_s1, 4  ;;  %s129_s19 = int_to_ptr.vmem [resolvable:$true] %s128_s19 }
   0x8   : > { %s657_s14 = smov (%p30_p1, %s28_s14), 0  ;;  %p581_p4 = pnand %p386_p0, %p108_p2 }
   0x9   : > { %s459_s20 = scalar_lea.vmem %s129_s19, 16  ;;  %p467_p11 = scmp.lt.s32.totalorder %s129_s19, %s129_s19 }
   0xa   : > { %p406_p5 = pneg %p581_p4  ;;  %p460_p7 = scmp.ne.s32.totalorder %s129_s19, %s459_s20 }
   0xb   : > { %p468_p12 = scmp.lt.s32.totalorder %s459_s20, %s459_s20 }
   0xc   : > { %p407_p6 = pnand %p575_p3, %p406_p5 }
   0xd   : > { %p469_p13 = por %p468_p12, %p467_p11 }
   0xe   : > { %p461_p8 = pneg %p407_p6 }
  0x10   : > { %p462_p9 = pnand %p461_p8, %p460_p7 }
  0x12   : > { %p463_p10 = pneg %p462_p9 }
  0x14   : > { %p470_p0 = pnand %p469_p13, %p463_p10 }
  0x16   : > { %473 = shalt.err (!%p470_p0)
}
  0x17   : > { %s532_s21 = smov [#allocation4]   ;;  %141 = sbr.rel (%p581_p4) target bundleno = 655 (0x28f), region = 28 }
  0x18   : > { %409 = dma.vmem_to_smem (!%p407_p6), %s129_s19, 16, %s532_s21, [#allocation6]  }
  0x1e   : > { %513 = dma.done.wait (%p575_p3), [#allocation6], 16  }
  0x1f   : > { %515 = vsyncadd (%p575_p3), [#allocation6], 4294967280 }
  0x20   : > { %147 = sfence }
  0x21   : > { %s168_s22 = sld [smem:[#allocation4]]  ;;  %s391_s23 = sld [smem:[#allocation4 + $0x1]]  ;;  %v167_v0 = vld [vmem:[%s648_s0] sm:$0x1]  ;;  %v171_v1 = vld [vmem:[%s648_s0 + $0x1] sm:$0x1] }
  0x22   : > { %p392_p1 = scmp.ne.s32.totalorder %s522_s9, 0 }
  0x23   : > { %v225_v7 = vlaneseq (!%p392_p1)  ;;  %vm232_vm0 = vcmask (!%p392_p1), 1040384   ;;  %vm184_vm2 = vcmask (!%p392_p1), 0   ;;  %v533_v11 = vmov (!%p392_p1), -inf  }
  0x24   : > { %179 = sbr.rel (%p392_p1) target bundleno = 481 (0x1e1), region = 36  ;;  %185 = vst.msk [vmem:[#allocation2] sm:$0x1] (!%p392_p1), %vm184_vm2, %v533_v11  ;;  %v534_v12 = vmov (!%p392_p1), 0   ;;  %v535_v13 = vmov (!%p392_p1), 0.0  }
  0x25   : > { %v226_v8 = vand.u32 (!%p392_p1), 127, %v225_v7  ;;  %449 = vset.pattern.permute.xlu0 (!%p392_p1), %v534_v12  ;;  %186 = vst.msk [vmem:[#allocation3] sm:$0x1] (!%p392_p1), %vm184_vm2, %v535_v13  ;;  %v248_v18 = vshrl.u32 (!%p392_p1), %v225_v7, 7 }
  0x27   : > { %v169_v2 = vstv %s168_s22  ;;  %v173_v4 = vstv %s391_s23  ;;  %vm229_vm1 = vcmp.lt.s32.totalorder (!%p392_p1), %v226_v8, 16  ;;  %v249_v19 = vsub.s32 (!%p392_p1), 0, %v248_v18 }
  0x28   : > { %v170_v3 = vmul.f32 %v169_v2, %v167_v0  ;;  %v174_v5 = vmul.f32 %v173_v4, %v171_v1 }
  0x2a   : > { %v175_v6 = vadd.f32 %v174_v5, %v170_v3 }
  0x2b   : > { %v231_v14 = vld [vmem:[#allocation2] sm:$0x1] }
  0x2c   : > { %v230_v9 = vsel %vm229_vm1, %v175_v6, -inf  ;;  %v237_v28 = vld [vmem:[#allocation3] sm:$0x1] }
  0x2d   : > { %v233_v10 = vsel %vm232_vm0, %v230_v9, -inf }
  0x2e   : > { %234 = vmax.xlane.f32.xlu0 %v233_v10 }
  0xbb   : > { %v235_v15 = vpop.xlane.xlu0 %234 }
  0xbc   : > { %v236_v16 = vmax.f32 %v231_v14, %v235_v15 }
  0xbe   : > { %v238_v17 = vsub.f32 %v231_v14, %v236_v16  ;;  %260 = vst.msk [vmem:[#allocation2] sm:$0x1] %vm184_vm2, %v236_v16  ;;  %244 = vperm.xlu0 %449, %v236_v16  }
  0xc0   : > { %v239_v26 = vmul.f32 1.442695, %v238_v17 }
 0x13d   : > { %v245_v20 = vpop.permute.xlu0 %244 }
 0x13e   : > { %v250_v21 = vrot.slane %v245_v20, %v249_v19 }
 0x140   : > { %v251_v22 = vsub.f32 %v230_v9, %v250_v21 }
 0x142   : > { %v252_v23 = vmul.f32 1.442695, %v251_v22 }
 0x144   : > { %450 = vpow2.f32 %v252_v23 }
 0x145   : > { %452 = vpow2.f32 %v239_v26 }
 0x14e   : > { %v451_v24 = vpop.eup %450 }
 0x14f   : > { %v254_v25 = vsel %vm232_vm0, %v451_v24, 0.0  ;;  %v453_v27 = vpop.eup %452 }
 0x150   : > { %255 = vadd.xlane.f32.xlu1 %v254_v25  ;;  %v241_v29 = vmul.f32 %v453_v27, %v237_v28 }
 0x1dd   : > { %v256_v30 = vpop.xlane.xlu1 %255 }
 0x1de   : > { %v257_v31 = vadd.f32 %v256_v30, %v241_v29 }
 0x1e0   : > { %259 = vst.msk [vmem:[#allocation3] sm:$0x1] %vm184_vm2, %v257_v31 }
 0x1e1 PF: > { %p393_p2 = scmp.ne.s32.totalorder %s522_s9, 1 }
 0x1e2   : > { %v268_v32 = vld [vmem:[#allocation2] sm:$0x1] (!%p393_p2)  ;;  %v536_v34 = vmov (!%p393_p2), 0   ;;  %v274_v36 = vlaneseq (!%p393_p2) }
 0x1e3   : > { %264 = sbr.rel (%p393_p2) target bundleno = 632 (0x278), region = 52  ;;  %454 = vset.pattern.permute.xlu0 (!%p393_p2), %v536_v34 }
 0x1e4   : > { %271 = vperm.xlu0 (!%p393_p2), %454, %v268_v32   ;;  %v275_v37 = vshrl.u32 (!%p393_p2), %v274_v36, 7 }
 0x1e6   : > { %v276_v38 = vsub.s32 (!%p393_p2), 0, %v275_v37 }
 0x1e7   : > { %v265_v33 = vld [vmem:[#allocation3] sm:$0x1] (!%p393_p2) }
 0x1e8   : > { %455 = vrcp.f32 (!%p393_p2), %v265_v33 }
 0x1f2   : > { %v456_v35 = vpop.eup %455 }
 0x1f3   : > { %283 = vperm.xlu0 %454, %v456_v35  }
 0x263   : > { %v272_v39 = vpop.permute.xlu0 %271 }
 0x264   : > { %v277_v40 = vrot.slane %v272_v39, %v276_v38 }
 0x266   : > { %v278_v41 = vsub.f32 %v175_v6, %v277_v40 }
 0x268   : > { %v279_v42 = vmul.f32 1.442695, %v278_v41 }
 0x26a   : > { %457 = vpow2.f32 %v279_v42 }
 0x272   : > { %v284_v43 = vpop.permute.xlu0 %283 }
 0x273   : > { %v289_v44 = vrot.slane %v284_v43, %v276_v38 }
 0x274   : > { %v458_v45 = vpop.eup %457 }
 0x275   : > { %v290_v46 = vmul.f32 %v458_v45, %v289_v44 }
 0x277   : > { %291 = vst [vmem:[#allocation7] sm:$0x1] %v290_v46 }
 0x278 PF: > { %p614_p3 = scmp.eq.s32.totalorder %s384_s12, 1  ;;  %s537_s29 = smov [#allocation7]  }
 0x279   : > { %s306_s30 = sshll.u32 %s537_s29, 4  ;;  %s307_s30 = int_to_ptr.vmem [resolvable:$true] %s306_s30 }
 0x27a   : > { %s474_s3 = scalar_lea.vmem %s307_s30, 16  ;;  %s480_s4 = scalar_lea.vmem %s307_s30, 32 }
 0x27b   : > { %p475_p4 = scmp.ne.s32.totalorder %s307_s30, %s474_s3  ;;  %p481_p7 = scmp.lt.s32.totalorder %s307_s30, %s307_s30 }
 0x27c   : > { %p482_p8 = scmp.lt.s32.totalorder %s480_s4, %s474_s3 }
 0x27d   : > { %p476_p5 = pnand %p475_p4, %p614_p3 }
 0x27e   : > { %p483_p9 = por %p482_p8, %p481_p7 }
 0x27f   : > { %p477_p6 = pneg %p476_p5 }
 0x281   : > { %p484_p10 = pnand %p483_p9, %p477_p6 }
 0x283   : > { %487 = shalt.err (!%p484_p10)
}
 0x284   : > { %s488_s7 = scalar_lea.hbm %s650_s2, 16 }
 0x285   : > { %p489_p11 = scmp.ne.s32.totalorder %s650_s2, %s488_s7  ;;  %p494_p0 = scmp.lt.u32.totalorder %s488_s7, %s650_s2 }
 0x287   : > { %p490_p12 = pnand %p489_p11, %p614_p3 }
 0x289   : > { %p491_p13 = pneg %p490_p12 }
 0x28b   : > { %p496_p1 = pnand %p494_p0, %p491_p13 }
 0x28d   : > { %499 = shalt.err (!%p496_p1)
}
 0x28e   : > { %403 = dma.vmem_to_hbm [thread:$0]  (%p614_p3), %s307_s30, 16, %s650_s2, [#allocation5]  }
 0x28f PF: > { %p417_p2 = scmp.ge.s32.totalorder %s530_s11, 2  ;;  %p418_p4 = scmp.eq.s32.totalorder %s385_s13, 1 }
 0x291   : > { %p411_p5 = pnand %p418_p4, %p417_p2 }
 0x293   : > { %517 = dma.done.wait (!%p411_p5), [#allocation5], 16  }
 0x294   : > { %519 = vsyncadd (!%p411_p5), [#allocation5], 4294967280  ;;  %s16_s11 = sadd.s32 1, %s530_s11   ;;  %s654_s9 = smov %s526_s10 }
 0x295   : > { %p13_p6 = scmp.ge.s32.totalorder %s16_s11, 4   ;;  %s655_s10 = smov %s657_s14 }
 0x297   :  { %15 = sbr.rel (!%p13_p6) target bundleno = 4 (0x4), region = 88 }
 0x29e   :  { %323 = vsyncpa [#allocation5], 1 }
 0x29f   :  { %325 = vsyncpa [#allocation5 + $0x1], 1 }
 0x2a0   :  { %326 = vsyncpa [#allocation6], 1 }
 0x2a1   :  { %328 = vsyncpa [#allocation6 + $0x1], 1 }

</bundles_post_ra>
